<compile_context>
chip_gen: v7x
topology: tpu7x:2x2x1
jax: 0.10.0
libtpu: 0.0.40
codegen_flags: <defaults>
</compile_context>

<pallas_src>
import functools

import jax
import jax.numpy as jnp
from jax.experimental import pallas as pl
from jax.experimental.pallas import tpu as pltpu

_LANES = 128
_SUBLANES = 8
_B_TILE_CAP = 1024   # ~512-row tiles already hit ~85% of HBM roofline


def _round_up(x, m):
    return ((x + m - 1) // m) * m


def _cdiv(a, b):
    return (a + b - 1) // b


def _log_sigmoid(x):
    # Numerically stable log(sigmoid(x)) = min(x, 0) - log(1 + exp(-|x|)).
    return jnp.minimum(x, 0.0) - jnp.log(1.0 + jnp.exp(-jnp.abs(x)))


def _ultragcn_loss_kernel(user_ref, pos_ref, neg_ref, nbr_ref, side_ref,
                          out_ref, *, b_total, b_tile, k):
    u = user_ref[...].astype(jnp.float32)        # (Bt, D)
    p = pos_ref[...].astype(jnp.float32)         # (Bt, D)
    n = neg_ref[...].astype(jnp.float32)         # (Bt, D)

    # Lane-dense f32 side-band: [w_0 .. w_{K-1}, pos_beta, neg_beta, 0 ...]
    side = side_ref[...]                         # (Bt, side_w) f32
    w = side[:, :k]                              # (Bt, K)
    pb = side[:, k:k + 1]                        # (Bt, 1)
    nb = side[:, k + 1:k + 2]                    # (Bt, 1)

    # Row dot products along D (lane axis).
    pos_logits = jnp.sum(u * p, axis=-1, keepdims=True)        # (Bt, 1)
    neg_logits = jnp.sum(u * n, axis=-1, keepdims=True)        # (Bt, 1)

    nbr = nbr_ref[...].astype(jnp.float32)                     # (Bt, K, D)
    nbr_logits = jnp.sum(u[:, None, :] * nbr, axis=-1)         # (Bt, K)

    ls_pos = _log_sigmoid(pos_logits)      # (Bt, 1)
    ls_negn = _log_sigmoid(-neg_logits)    # (Bt, 1)

    # Fused per-row loss (single global reduction instead of 5):
    #   LO + LC rows: -(1 + pos_beta)*log_sig(pos) - (1 + neg_beta)*log_sig(-neg)
    #   LI rows (x2.5): 2.5 * sum_k(-log_sig(nbr_logits) * w)
    nbr_row = jnp.sum(-_log_sigmoid(nbr_logits) * w, axis=-1,
                      keepdims=True)                            # (Bt, 1)
    row_loss = (-(1.0 + pb) * ls_pos
                - (1.0 + nb) * ls_negn
                + 2.5 * nbr_row)                                # (Bt, 1)

    # Mask out padded tail rows (must contribute exactly 0).
    row_start = pl.program_id(0) * b_tile
    row_ids = row_start + jax.lax.broadcasted_iota(jnp.int32, (b_tile, 1), 0)
    row_loss = jnp.where(row_ids < b_total, row_loss, 0.0)

    # Lane-dense (1, 8, 128) partial-sum block: unmasked store; the wrapper
    # reads element [tile, 0, 0] of each tile.
    out_ref[...] = jnp.full(out_ref.shape, jnp.sum(row_loss),
                            dtype=out_ref.dtype)


def _vmem_caps():
    # budget: what we size the working set against (3/8 of physical VMEM,
    # leaving room for double-buffering and compiler scratch).
    # limit: scoped-VMEM ceiling handed to the compiler (3/4 of physical).
    try:
        cap = pltpu.get_tpu_info().vmem_capacity_bytes
    except Exception:  # pragma: no cover - conservative fallback (v7x-sized)
        cap = 64 * 1024 * 1024
    return (cap * 3) // 8, (cap * 3) // 4


def ultragcn_matrix_forward(embs, user, pos, neg, pos_beta, neg_beta,
                            weights, neighbor, user_num, *,
                            b_tile=None, stream_dtype=jnp.bfloat16):
    B = user.shape[0]
    D = embs.shape[1]
    K = neighbor.shape[1]
    stream_dt = embs.dtype if stream_dtype is None else jnp.dtype(stream_dtype)
    itemsize = jnp.dtype(stream_dt).itemsize
    side_w = _round_up(K + 2, _LANES)

    budget, vmem_limit = _vmem_caps()
    if b_tile is None:
        # Per-row VMEM: double-buffered stream blocks, f32 upcast/product
        # temporaries of the neighbor block, and the side-band.
        per_row = (2 * (K * D + 3 * D) * itemsize    # double-buffered streams
                   + 2 * K * D * 4 + 4 * D * 4       # f32 upcast/product temps
                   + 2 * side_w * 4)                 # double-buffered side-band
        bt = max(_SUBLANES, budget // max(per_row, 1))
        bt = min(bt, _B_TILE_CAP)
        # Keep >= 2 grid steps when the batch allows it (megacore / 2 TCs).
        bt = min(bt, max(_SUBLANES, _round_up(_cdiv(B, 2), _SUBLANES)))
        b_tile = max(_SUBLANES, (bt // _SUBLANES) * _SUBLANES)
    b_tile = max(_SUBLANES, (b_tile // _SUBLANES) * _SUBLANES)

    b_pad = _round_up(B, b_tile)
    num_tiles = b_pad // b_tile
    pad = b_pad - B

    # Pad the *index* arrays (cheap int32) instead of the gathered tensors so
    # the big (B, K, D) gather output never gets a second HBM copy via jnp.pad.
    pos_beta = pos_beta.reshape(B)
    neg_beta = neg_beta.reshape(B)
    if pad:
        user = jnp.concatenate([user, jnp.zeros((pad,), dtype=user.dtype)])
        pos = jnp.concatenate(
            [pos, jnp.full((pad,), user_num, dtype=pos.dtype)])
        neg = jnp.concatenate(
            [neg, jnp.full((pad,), user_num, dtype=neg.dtype)])
        pos_beta = jnp.concatenate(
            [pos_beta, jnp.zeros((pad,), dtype=pos_beta.dtype)])
        neg_beta = jnp.concatenate(
            [neg_beta, jnp.zeros((pad,), dtype=neg_beta.dtype)])

    # Cast the table to the stream dtype BEFORE the gathers: the (B, K, D)
    # intermediate is written and re-read from HBM in bf16, not f32.
    # TODO(synk): fuse the embs[pos_neighbor] gather into the kernel (scalar
    # prefetch of the index slab + manual double-buffered row DMAs) to remove
    # the HBM round-trip of the neighbor intermediate entirely.
    embs_s = embs if stream_dtype is None else embs.astype(stream_dt)

    user_emb = embs_s[user]                      # (b_pad, D)
    pos_emb = embs_s[pos]                        # (b_pad, D)
    neg_emb = embs_s[neg]                        # (b_pad, D)
    pos_idx = pos - user_num
    pos_neighbor = neighbor[pos_idx]             # (b_pad, K)
    pos_neighbor_emb = embs_s[pos_neighbor]      # (b_pad, K, D)
    pos_weight = weights[pos_idx].astype(jnp.float32)   # (b_pad, K)

    # One lane-dense f32 side-band block: [weights, pos_beta, neg_beta, 0...].
    side = jnp.concatenate(
        [pos_weight,
         pos_beta.astype(jnp.float32)[:, None],
         neg_beta.astype(jnp.float32)[:, None],
         jnp.zeros((b_pad, side_w - (K + 2)), dtype=jnp.float32)],
        axis=1)                                  # (b_pad, side_w)

    kernel = functools.partial(_ultragcn_loss_kernel,
                               b_total=B, b_tile=b_tile, k=K)

    flops = 2 * b_pad * D * (K + 2) + 12 * b_pad * (K + 2)
    transcendentals = 2 * b_pad * (K + 2)
    bytes_accessed = (itemsize * b_pad * (K + 3) * D
                      + 4 * b_pad * side_w
                      + 4 * num_tiles * _SUBLANES * _LANES)

    partials = pl.pallas_call(
        kernel,
        out_shape=jax.ShapeDtypeStruct((num_tiles, _SUBLANES, _LANES),
                                       jnp.float32),
        grid=(num_tiles,),
        in_specs=[
            pl.BlockSpec((b_tile, D), lambda i: (i, 0)),
            pl.BlockSpec((b_tile, D), lambda i: (i, 0)),
            pl.BlockSpec((b_tile, D), lambda i: (i, 0)),
            pl.BlockSpec((b_tile, K, D), lambda i: (i, 0, 0)),
            pl.BlockSpec((b_tile, side_w), lambda i: (i, 0)),
        ],
        out_specs=pl.BlockSpec((1, _SUBLANES, _LANES), lambda i: (i, 0, 0)),
        compiler_params=pltpu.CompilerParams(
            dimension_semantics=("parallel",),
            vmem_limit_bytes=vmem_limit),
        cost_estimate=pl.CostEstimate(
            flops=flops,
            transcendentals=transcendentals,
            bytes_accessed=bytes_accessed),
    )(user_emb, pos_emb, neg_emb, pos_neighbor_emb, side)

    return jnp.sum(partials[:, 0, 0])


def ultragcn_matrix_reference(embs, user, pos, neg, pos_beta, neg_beta,
                              weights, neighbor, user_num):
    user_emb = embs[user]
    pos_emb = embs[pos]
    neg_emb = embs[neg]
    pos_neighbor = neighbor[pos - user_num]
    pos_weight = weights[pos - user_num]
    pos_neighbor_emb = embs[pos_neighbor]
    pos_logits = jnp.einsum('id,id->i', user_emb, pos_emb)
    neg_logits = jnp.einsum('id,id->i', user_emb, neg_emb)
    pnl = jnp.einsum('id,ikd->ik', user_emb, pos_neighbor_emb)
    pnl = -jnp.log(jax.nn.sigmoid(pnl))
    LI = jnp.sum(pnl * pos_weight)
    LO = (-jnp.sum(jnp.log(jax.nn.sigmoid(pos_logits)))
          - jnp.sum(jnp.log(jax.nn.sigmoid(-neg_logits))))
    LC = (-jnp.sum(jnp.log(jax.nn.sigmoid(pos_logits)) * pos_beta)
          - jnp.sum(jnp.log(jax.nn.sigmoid(-neg_logits)) * neg_beta))
    return LC + LO + LI * 2.5


if __name__ == "__main__":
    user_num = 32
    item_num = 32
    hidden = 128    # lane-dense last dim (multiple of 128)
    B = 20          # not a multiple of the tile -> exercises tail masking
    K = 8           # neighbors per positive item

    key = jax.random.PRNGKey(0)
    k_emb, k_u, k_p, k_n, k_nbr, k_w, k_pb, k_nb = jax.random.split(key, 8)

    # Deterministic "nn.Embedding" table init.
    embs = 0.1 * jax.random.normal(
        k_emb, (user_num + item_num, hidden), dtype=jnp.float32)

    user = jax.random.randint(k_u, (B,), 0, user_num)
    pos = jax.random.randint(k_p, (B,), user_num, user_num + item_num)
    neg = jax.random.randint(k_n, (B,), user_num, user_num + item_num)

    # Item->item neighbor table and weights, indexed by (item - user_num).
    neighbor = jax.random.randint(
        k_nbr, (item_num, K), user_num, user_num + item_num)
    weights = jax.random.uniform(k_w, (item_num, K), dtype=jnp.float32)

    pos_beta = jax.random.uniform(k_pb, (B,), dtype=jnp.float32)
    neg_beta = jax.random.uniform(k_nb, (B,), dtype=jnp.float32)

    ref = ultragcn_matrix_reference(
        embs, user, pos, neg, pos_beta, neg_beta, weights, neighbor, user_num)

    # Default path: bf16 streaming (production config). Small tile so the
    # grid (3 tiles), tail masking and partial-sum reduction are exercised.
    loss_bf16 = ultragcn_matrix_forward(
        embs, user, pos, neg, pos_beta, neg_beta, weights, neighbor,
        user_num, b_tile=8)
    loss_bf16 = jax.block_until_ready(loss_bf16)
    assert jnp.allclose(loss_bf16, ref, rtol=2e-2, atol=5e-1), (loss_bf16, ref)

    # f32 streaming path: must match the reference tightly.
    loss_f32 = ultragcn_matrix_forward(
        embs, user, pos, neg, pos_beta, neg_beta, weights, neighbor,
        user_num, b_tile=8, stream_dtype=None)
    loss_f32 = jax.block_until_ready(loss_f32)
    assert jnp.allclose(loss_f32, ref, rtol=1e-5, atol=1e-5), (loss_f32, ref)

    print("KERNEL_OK")
</pallas_src>

<mosaic_0001>
module attributes {stable_mosaic.version = 11 : i64} {
  func.func @_ultragcn_loss_kernel(%arg0: i32, %arg1: memref<8x128xbf16, #tpu.memory_space<vmem>>, %arg2: memref<8x128xbf16, #tpu.memory_space<vmem>>, %arg3: memref<8x128xbf16, #tpu.memory_space<vmem>>, %arg4: memref<8x8x128xbf16, #tpu.memory_space<vmem>>, %arg5: memref<8x128xf32, #tpu.memory_space<vmem>>, %arg6: memref<1x8x128xf32, #tpu.memory_space<vmem>>) attributes {dimension_semantics = [#tpu.dimension_semantics<parallel>], iteration_bounds = array<i64: 3>, scalar_prefetch = 0 : i64, scratch_operands = 0 : i64, tpu.core_type = #tpu.core_type<tc>, window_params = [{transform_indices = @transform_0, window_bounds = array<i64: 8, 128>}, {transform_indices = @transform_1, window_bounds = array<i64: 8, 128>}, {transform_indices = @transform_2, window_bounds = array<i64: 8, 128>}, {transform_indices = @transform_3, window_bounds = array<i64: 8, 8, 128>}, {transform_indices = @transform_4, window_bounds = array<i64: 8, 128>}, {transform_indices = @transform_5, window_bounds = array<i64: 1, 8, 128>}]} {
    %c0 = arith.constant 0 : index
    %c0_0 = arith.constant 0 : index
    %0 = vector.load %arg1[%c0, %c0_0] : memref<8x128xbf16, #tpu.memory_space<vmem>>, vector<8x128xbf16>
    %1 = arith.extf %0 : vector<8x128xbf16> to vector<8x128xf32>
    %c0_1 = arith.constant 0 : index
    %c0_2 = arith.constant 0 : index
    %2 = vector.load %arg2[%c0_1, %c0_2] : memref<8x128xbf16, #tpu.memory_space<vmem>>, vector<8x128xbf16>
    %3 = arith.extf %2 : vector<8x128xbf16> to vector<8x128xf32>
    %c0_3 = arith.constant 0 : index
    %c0_4 = arith.constant 0 : index
    %4 = vector.load %arg3[%c0_3, %c0_4] : memref<8x128xbf16, #tpu.memory_space<vmem>>, vector<8x128xbf16>
    %5 = arith.extf %4 : vector<8x128xbf16> to vector<8x128xf32>
    %c0_5 = arith.constant 0 : index
    %c0_6 = arith.constant 0 : index
    %6 = vector.load %arg5[%c0_5, %c0_6] : memref<8x128xf32, #tpu.memory_space<vmem>>, vector<8x128xf32>
    %7 = vector.extract_strided_slice %6 {offsets = [0, 0], sizes = [8, 8], strides = [1, 1]} : vector<8x128xf32> to vector<8x8xf32>
    %8 = vector.extract_strided_slice %6 {offsets = [0, 8], sizes = [8, 1], strides = [1, 1]} : vector<8x128xf32> to vector<8x1xf32>
    %9 = vector.extract_strided_slice %6 {offsets = [0, 9], sizes = [8, 1], strides = [1, 1]} : vector<8x128xf32> to vector<8x1xf32>
    %10 = arith.mulf %1, %3 : vector<8x128xf32>
    %cst = arith.constant dense<0.000000e+00> : vector<8xf32>
    %11 = vector.multi_reduction <add>, %10, %cst [1] : vector<8x128xf32> to vector<8xf32>
    %12 = vector.shape_cast %11 : vector<8xf32> to vector<8x1xf32>
    %13 = arith.mulf %1, %5 : vector<8x128xf32>
    %cst_7 = arith.constant dense<0.000000e+00> : vector<8xf32>
    %14 = vector.multi_reduction <add>, %13, %cst_7 [1] : vector<8x128xf32> to vector<8xf32>
    %15 = vector.shape_cast %14 : vector<8xf32> to vector<8x1xf32>
    %c0_8 = arith.constant 0 : index
    %c0_9 = arith.constant 0 : index
    %c0_10 = arith.constant 0 : index
    %16 = vector.load %arg4[%c0_8, %c0_9, %c0_10] : memref<8x8x128xbf16, #tpu.memory_space<vmem>>, vector<8x8x128xbf16>
    %17 = arith.extf %16 : vector<8x8x128xbf16> to vector<8x8x128xf32>
    %18 = vector.shape_cast %1 : vector<8x128xf32> to vector<8x1x128xf32>
    %19 = vector.broadcast %18 : vector<8x1x128xf32> to vector<8x8x128xf32>
    %20 = arith.mulf %19, %17 : vector<8x8x128xf32>
    %cst_11 = arith.constant dense<0.000000e+00> : vector<8x8xf32>
    %21 = vector.multi_reduction <add>, %20, %cst_11 [2] : vector<8x8x128xf32> to vector<8x8xf32>
    %cst_12 = arith.constant 0.000000e+00 : f32
    %22 = vector.broadcast %cst_12 : f32 to vector<8x1xf32>
    %23 = arith.minimumf %12, %22 : vector<8x1xf32>
    %24 = math.absf %12 : vector<8x1xf32>
    %cst_13 = arith.constant 0.000000e+00 : f32
    %25 = vector.broadcast %cst_13 : f32 to vector<8x1xf32>
    %26 = arith.subf %25, %24 : vector<8x1xf32>
    %27 = math.exp %26 : vector<8x1xf32>
    %cst_14 = arith.constant 1.000000e+00 : f32
    %28 = vector.broadcast %cst_14 : f32 to vector<8x1xf32>
    %29 = arith.addf %28, %27 : vector<8x1xf32>
    %30 = math.log %29 : vector<8x1xf32>
    %31 = arith.subf %23, %30 : vector<8x1xf32>
    %cst_15 = arith.constant 0.000000e+00 : f32
    %32 = vector.broadcast %cst_15 : f32 to vector<8x1xf32>
    %33 = arith.subf %32, %15 : vector<8x1xf32>
    %cst_16 = arith.constant 0.000000e+00 : f32
    %34 = vector.broadcast %cst_16 : f32 to vector<8x1xf32>
    %35 = arith.minimumf %33, %34 : vector<8x1xf32>
    %36 = math.absf %33 : vector<8x1xf32>
    %cst_17 = arith.constant 0.000000e+00 : f32
    %37 = vector.broadcast %cst_17 : f32 to vector<8x1xf32>
    %38 = arith.subf %37, %36 : vector<8x1xf32>
    %39 = math.exp %38 : vector<8x1xf32>
    %cst_18 = arith.constant 1.000000e+00 : f32
    %40 = vector.broadcast %cst_18 : f32 to vector<8x1xf32>
    %41 = arith.addf %40, %39 : vector<8x1xf32>
    %42 = math.log %41 : vector<8x1xf32>
    %43 = arith.subf %35, %42 : vector<8x1xf32>
    %cst_19 = arith.constant 0.000000e+00 : f32
    %44 = vector.broadcast %cst_19 : f32 to vector<8x8xf32>
    %45 = arith.minimumf %21, %44 : vector<8x8xf32>
    %46 = math.absf %21 : vector<8x8xf32>
    %cst_20 = arith.constant 0.000000e+00 : f32
    %47 = vector.broadcast %cst_20 : f32 to vector<8x8xf32>
    %48 = arith.subf %47, %46 : vector<8x8xf32>
    %49 = math.exp %48 : vector<8x8xf32>
    %cst_21 = arith.constant 1.000000e+00 : f32
    %50 = vector.broadcast %cst_21 : f32 to vector<8x8xf32>
    %51 = arith.addf %50, %49 : vector<8x8xf32>
    %52 = math.log %51 : vector<8x8xf32>
    %53 = arith.subf %45, %52 : vector<8x8xf32>
    %cst_22 = arith.constant 0.000000e+00 : f32
    %54 = vector.broadcast %cst_22 : f32 to vector<8x8xf32>
    %55 = arith.subf %54, %53 : vector<8x8xf32>
    %56 = arith.mulf %55, %7 : vector<8x8xf32>
    %cst_23 = arith.constant dense<0.000000e+00> : vector<8xf32>
    %57 = vector.multi_reduction <add>, %56, %cst_23 [1] : vector<8x8xf32> to vector<8xf32>
    %58 = vector.shape_cast %57 : vector<8xf32> to vector<8x1xf32>
    %cst_24 = arith.constant 1.000000e+00 : f32
    %59 = vector.broadcast %cst_24 : f32 to vector<8x1xf32>
    %60 = arith.addf %59, %8 : vector<8x1xf32>
    %cst_25 = arith.constant 0.000000e+00 : f32
    %61 = vector.broadcast %cst_25 : f32 to vector<8x1xf32>
    %62 = arith.subf %61, %60 : vector<8x1xf32>
    %63 = arith.mulf %62, %31 : vector<8x1xf32>
    %cst_26 = arith.constant 1.000000e+00 : f32
    %64 = vector.broadcast %cst_26 : f32 to vector<8x1xf32>
    %65 = arith.addf %64, %9 : vector<8x1xf32>
    %66 = arith.mulf %65, %43 : vector<8x1xf32>
    %67 = arith.subf %63, %66 : vector<8x1xf32>
    %cst_27 = arith.constant 2.500000e+00 : f32
    %68 = vector.broadcast %cst_27 : f32 to vector<8x1xf32>
    %69 = arith.mulf %68, %58 : vector<8x1xf32>
    %70 = arith.addf %67, %69 : vector<8x1xf32>
    %c8_i32 = arith.constant 8 : i32
    %71 = arith.muli %arg0, %c8_i32 : i32
    %72 = tpu.iota {dimensions = array<i32: 0>} : vector<8x1xi32>
    %73 = vector.broadcast %71 : i32 to vector<8x1xi32>
    %74 = arith.addi %73, %72 : vector<8x1xi32>
    %c20_i32 = arith.constant 20 : i32
    %75 = vector.broadcast %c20_i32 : i32 to vector<8x1xi32>
    %76 = arith.cmpi slt, %74, %75 : vector<8x1xi32>
    %cst_28 = arith.constant 0.000000e+00 : f32
    %77 = vector.broadcast %cst_28 : f32 to vector<8x1xf32>
    %78 = arith.select %76, %70, %77 : vector<8x1xi1>, vector<8x1xf32>
    %79 = vector.shape_cast %78 : vector<8x1xf32> to vector<1x8x1xf32>
    %cst_29 = arith.constant dense<0.000000e+00> : vector<1xf32>
    %80 = vector.multi_reduction <add>, %79, %cst_29 [1, 2] : vector<1x8x1xf32> to vector<1xf32>
    %81 = vector.shape_cast %80 : vector<1xf32> to vector<1x1x1xf32>
    %82 = vector.extract %81[0, 0, 0] : f32 from vector<1x1x1xf32>
    %83 = vector.broadcast %82 : f32 to vector<1x8x128xf32>
    %c0_30 = arith.constant 0 : index
    %c0_31 = arith.constant 0 : index
    %c0_32 = arith.constant 0 : index
    %84 = vector.load %arg6[%c0_30, %c0_31, %c0_32] : memref<1x8x128xf32, #tpu.memory_space<vmem>>, vector<1x8x128xf32>
    tpu.vector_store %arg6[%c0_30, %c0_31, %c0_32], %83 {strides = array<i32>} : memref<1x8x128xf32, #tpu.memory_space<vmem>>, vector<1x8x128xf32>,
    return
  }
  func.func @transform_0(%arg0: i32) -> (i32, i32) {
    %c0_i32 = arith.constant 0 : i32
    %c0_i32_0 = arith.constant 0 : i32
    return %arg0, %c0_i32 : i32, i32
  }
  func.func @transform_1(%arg0: i32) -> (i32, i32) {
    %c0_i32 = arith.constant 0 : i32
    %c0_i32_0 = arith.constant 0 : i32
    return %arg0, %c0_i32 : i32, i32
  }
  func.func @transform_2(%arg0: i32) -> (i32, i32) {
    %c0_i32 = arith.constant 0 : i32
    %c0_i32_0 = arith.constant 0 : i32
    return %arg0, %c0_i32 : i32, i32
  }
  func.func @transform_3(%arg0: i32) -> (i32, i32, i32) {
    %c0_i32 = arith.constant 0 : i32
    %c0_i32_0 = arith.constant 0 : i32
    %c0_i32_1 = arith.constant 0 : i32
    return %arg0, %c0_i32, %c0_i32_0 : i32, i32, i32
  }
  func.func @transform_4(%arg0: i32) -> (i32, i32) {
    %c0_i32 = arith.constant 0 : i32
    %c0_i32_0 = arith.constant 0 : i32
    return %arg0, %c0_i32 : i32, i32
  }
  func.func @transform_5(%arg0: i32) -> (i32, i32, i32) {
    %c0_i32 = arith.constant 0 : i32
    %c0_i32_0 = arith.constant 0 : i32
    %c0_i32_1 = arith.constant 0 : i32
    return %arg0, %c0_i32, %c0_i32_0 : i32, i32, i32
  }
}

</mosaic_0001>

<bundles_post_ra>
// kernel: tpu_custom_call.1
= control target key start
LH: loop header
LB: loop body
LE: loop exit
PB: predicated region body
PF: predicated region fallthrough
CT: control target
= control target key end

     0   :  { %s1800_s0 = inlined_call_operand.hbm [shape: bf16[24,128], index: 0, kind: input, shape index: {}]   ;;  %s1801_s1 = inlined_call_operand.hbm [shape: bf16[24,128], index: 1, kind: input, shape index: {}]   ;;  %s1802_s2 = inlined_call_operand.hbm [shape: bf16[24,128], index: 2, kind: input, shape index: {}]   ;;  %s1803_s3 = inlined_call_operand.hbm [shape: bf16[24,8,128], index: 3, kind: input, shape index: {}]   ;;  %s1804_s4 = inlined_call_operand.hbm [shape: f32[24,128], index: 4, kind: input, shape index: {}]   ;;  %s1805_s5 = inlined_call_operand.hbm [shape: f32[3,8,128], index: 5, kind: output, shape index: {}]  }
   0x1   :  { %1815 = sst [smem:[#allocation20_spill]] %s1801_s1 }
   0x2   :  { %1816 = sst [smem:[#allocation21_spill]] %s1803_s3 }
   0x3   :  { %10 = vsyncpa [#allocation3], 0 }
   0x4   :  { %12 = vsyncpa [#allocation3 + $0x1], 0 }
   0x5   :  { %13 = vsyncpa [#allocation6], 0 }
   0x6   :  { %15 = vsyncpa [#allocation6 + $0x1], 0 }
   0x7   :  { %16 = vsyncpa [#allocation9], 0 }
   0x8   :  { %18 = vsyncpa [#allocation9 + $0x1], 0 }
   0x9   :  { %19 = vsyncpa [#allocation4], 0 }
   0xa   :  { %21 = vsyncpa [#allocation4 + $0x1], 0  ;;  %s1421_s18 = smov 0   ;;  %s1423_s19 = smov 0  }
   0xb   :  { %s1425_s20 = smov 0   ;;  %s1427_s21 = smov 0  }
   0xc LB: > { %1817 = sst [smem:[#allocation16_spill]] %s1373_s20  ;;  %s1442_s22 = sadd.s32 4294967295, %s1377_s21   ;;  %s1377_s21 = sphi %s1427_s21, %s1837_s21   ;;  %s1373_s20 = sphi %s1425_s20, %s1839_s20   ;;  %s1369_s19 = sphi %s1423_s19, %s1841_s19   ;;  %s1365_s18 = sphi %s1421_s18, %s1840_s18  }
   0xd   : > { %s991_s23 = sadd.s32 4294967294, %s1377_s21   ;;  %s1446_s24 = sadd.s32 1, %s1377_s21  }
   0xe   : > { %1818 = sst [smem:[#allocation17_spill]] %s1446_s24  ;;  %s34_s25 = sadd.s32 1, %s1373_s20 }
   0xf   : > { %s31_s26 = ssub.s32 %s1377_s21, %s1446_s24  ;;  %p41_p0 = scmp.ne.s32.totalorder %s1373_s20, %s1369_s19 }
  0x10   : > { %p32_p1 = scmp.eq.s32.totalorder %s31_s26, 0  ;;  %p42_p2 = scmp.eq.s32.totalorder %s1377_s21, 0 }
  0x11   : > { %p47_p3 = scmp.ne.s32.totalorder %s1369_s19, %s1365_s18  ;;  %p48_p4 = scmp.eq.s32.totalorder %s1442_s22, 0 }
  0x12   : > { %s1458_s27 = scalar_select %p32_p1, %s1373_s20, %s34_s25  }
  0x13   : > { %p43_p5 = por %p42_p2, %p41_p0  ;;  %p1460_p6 = por %p48_p4, %p47_p3 }
  0x14   : > { %1819 = sst [smem:[#allocation18_spill]] %s1458_s27  ;;  %p175_p7 = scmp.eq.s32.totalorder %s1442_s22, 2 }
  0x15   : > { %s1820_s28 = scalar_select %p1460_p6, 1, 0 }
  0x16   : > { %p181_p8 = scmp.eq.s32.totalorder %s991_s23, 2  ;;  %p1071_p9 = scmp.lt.s32.totalorder %s1377_s21, 3 }
  0x17   : > { %p1466_p10 = por %p175_p7, %p41_p0  ;;  %s1475_s6 = sand.u32 1, %s1373_s20  }
  0x18   : > { %p1470_p11 = por %p181_p8, %p47_p3  ;;  %s1478_s7 = sshll.u32 %s1377_s21, 6 }
  0x19   : > { %s1821_s29 = scalar_select %p1466_p10, 1, 0 }
  0x1a   : > { %s1822_s30 = scalar_select %p1470_p11, 1, 0 }
  0x1b   : > { %s1481_s8 = sshll.u32 %s1475_s6, 2  ;;  %p1483_p12 = pnand %p1071_p9, %p43_p5 }
  0x1c   : > { %1823 = sst [smem:[#allocation19_spill]] %s1822_s30  ;;  %s1806_s10 = sand.u32 1, %s1377_s21  }
  0x1d   : > { %s1824_s9 = scalar_select %p1483_p12, 1, 0 }
  0x1e   : > { %s1825_s1 = sld [smem:[#allocation20_spill]]  ;;  %s223_s14 = scalar_lea.vmem [#allocation5], %s1481_s8 }
  0x1f   : > { %s230_s15 = sshll.u32 %s223_s14, 4  ;;  %s1499_s16 = scalar_lea.sflag [#allocation6], %s1806_s10  ;;  %s1495_s15 = int_to_ptr.vmem [resolvable:$true] %s230_s15 }
  0x20   : > { %p1505_p0 = pneg %p1483_p12 }
  0x24   : > { %s1492_s13 = scalar_lea.hbm %s1825_s1, %s1478_s7  ;;  %s1158_s11 = scalar_lea.hbm %s1825_s1, 192 }
  0x25   : > { %s1153_s17 = scalar_lea.hbm %s1492_s13, 64  ;;  %p1159_p3 = scmp.lt.u32.totalorder %s1492_s13, %s1825_s1 }
  0x26   : > { %p1154_p13 = scmp.ne.s32.totalorder %s1492_s13, %s1153_s17  ;;  %p1160_p4 = scmp.lt.u32.totalorder %s1158_s11, %s1153_s17 }
  0x27   : > { %p1162_p7 = scmp.lt.u32.totalorder %s1153_s17, %s1492_s13 }
  0x28   : > { %p1156_p1 = pnand %p1505_p0, %p1154_p13  ;;  %p1161_p5 = por %p1160_p4, %p1159_p3 }
  0x2a   : > { %p1157_p2 = pneg %p1156_p1  ;;  %p1163_p8 = por %p1162_p7, %p1161_p5 }
  0x2c   : > { %p1164_p9 = pnand %p1163_p8, %p1157_p2 }
  0x2e   : > { %1167 = shalt.err (!%p1164_p9)
}
  0x2f   : > { %s1168_s10 = scalar_lea.vmem %s1495_s15, 64  ;;  %s1379_s25 = smov [#allocation5]  }
  0x30   : > { %p1169_p13 = scmp.ne.s32.totalorder %s1495_s15, %s1168_s10  ;;  %s1173_s26 = sshll.u32 %s1379_s25, 4  ;;  %s1174_s26 = int_to_ptr.vmem [resolvable:$false] %s1173_s26 }
  0x31   : > { %s1175_s12 = scalar_lea.vmem %s1174_s26, 128  ;;  %p1176_p10 = scmp.lt.s32.totalorder %s1495_s15, %s1174_s26 }
  0x32   : > { %p1171_p1 = pnand %p1169_p13, %p1505_p0  ;;  %p1177_p6 = scmp.lt.s32.totalorder %s1175_s12, %s1168_s10 }
  0x34   : > { %p1172_p11 = pneg %p1171_p1  ;;  %p1178_p3 = por %p1177_p6, %p1176_p10 }
  0x36   : > { %p1179_p4 = pnand %p1178_p3, %p1172_p11 }
  0x38   : > { %1182 = shalt.err (!%p1179_p4)
}
  0x39   : > { %1057 = dma.hbm_to_vmem [thread:$0]  (!%p1483_p12), %s1492_s13, 64, %s1495_s15, %s1499_s16  }
  0x3a   : > { %p1005_p2 = scmp.ge.s32.totalorder %s1377_s21, 1  ;;  %p292_p5 = scmp.lt.s32.totalorder %s1377_s21, 4 }
  0x3b   : > { %s1000_s17 = sshll.u32 %s1475_s6, 5  ;;  %s1017_s11 = sshll.u32 %s1377_s21, 9 }
  0x3c   : > { %p1533_p7 = pnand %p1005_p2, %p292_p5  ;;  %s1828_s3 = sld [smem:[#allocation21_spill]] }
  0x3d   : > { %s259_s12 = scalar_lea.vmem [#allocation8], %s1000_s17  ;;  %s1829_s13 = sand.u32 1, %s1377_s21  }
  0x3e   : > { %s1827_s10 = scalar_select %p1533_p7, 1, 0 }
  0x3f   : > { %s266_s1 = sshll.u32 %s259_s12, 4  ;;  %s1546_s15 = scalar_lea.sflag [#allocation9], %s1829_s13  ;;  %s1542_s1 = int_to_ptr.vmem [resolvable:$true] %s266_s1 }
  0x42   : > { %s1540_s26 = scalar_lea.hbm %s1828_s3, %s1017_s11  ;;  %s1188_s11 = scalar_lea.hbm %s1828_s3, 1536 }
  0x43   : > { %s1183_s27 = scalar_lea.hbm %s1540_s26, 512  ;;  %p1189_p8 = scmp.lt.u32.totalorder %s1540_s26, %s1828_s3 }
  0x44   : > { %p1184_p6 = scmp.ne.s32.totalorder %s1540_s26, %s1183_s27  ;;  %p1190_p9 = scmp.lt.u32.totalorder %s1188_s11, %s1183_s27 }
  0x45   : > { %p1192_p1 = scmp.lt.u32.totalorder %s1183_s27, %s1540_s26 }
  0x46   : > { %p1186_p10 = pnand %p1184_p6, %p1505_p0  ;;  %p1191_p13 = por %p1190_p9, %p1189_p8 }
  0x48   : > { %p1187_p11 = pneg %p1186_p10  ;;  %p1193_p3 = por %p1192_p1, %p1191_p13 }
  0x4a   : > { %p1194_p4 = pnand %p1193_p3, %p1187_p11 }
  0x4c   : > { %1197 = shalt.err (!%p1194_p4)
}
  0x4d   : > { %s1198_s17 = scalar_lea.vmem %s1542_s1, 512  ;;  %s1380_s20 = smov [#allocation8]  }
  0x4e   : > { %p1199_p2 = scmp.ne.s32.totalorder %s1542_s1, %s1198_s17  ;;  %s1203_s12 = sshll.u32 %s1380_s20, 4  ;;  %s1204_s12 = int_to_ptr.vmem [resolvable:$false] %s1203_s12 }
  0x4f   : > { %s1205_s24 = scalar_lea.vmem %s1204_s12, 1024  ;;  %p1206_p10 = scmp.lt.s32.totalorder %s1542_s1, %s1204_s12 }
  0x50   : > { %p1201_p5 = pnand %p1199_p2, %p1505_p0  ;;  %p1207_p7 = scmp.lt.s32.totalorder %s1205_s24, %s1198_s17 }
  0x52   : > { %p1202_p6 = pneg %p1201_p5  ;;  %p1208_p8 = por %p1207_p7, %p1206_p10 }
  0x54   : > { %p1209_p9 = pnand %p1208_p8, %p1202_p6 }
  0x56   : > { %1212 = shalt.err (!%p1209_p9)
}
  0x57   : > { %s1381_s27 = smov 64   ;;  %s1382_s13 = smov 4  }
  0x58   : > { %1063 = dma.hbm_to_vmem [thread:$0]  (!%p1483_p12), %s1540_s26, 512, %s1542_s1, %s1546_s15, %s1381_s27, %s1381_s27, %s1382_s13  }
  0x59   : > { %s1574_s25 = scalar_lea.hbm %s1800_s0, %s1478_s7  ;;  %s205_s17 = scalar_lea.vmem [#allocation2], %s1481_s8 }
  0x5a   : > { %s212_s20 = sshll.u32 %s205_s17, 4  ;;  %s1583_s3 = scalar_lea.hbm %s1802_s2, %s1478_s7  ;;  %s1577_s20 = int_to_ptr.vmem [resolvable:$true] %s212_s20 }
  0x5b   : > { %s202_s30 = scalar_lea.sflag [#allocation3], %s1475_s6  ;;  %s1213_s1 = scalar_lea.hbm %s1574_s25, 64 }
  0x5c   : > { %p1214_p7 = scmp.ne.s32.totalorder %s1574_s25, %s1213_s1  ;;  %s1218_s13 = scalar_lea.hbm %s1800_s0, 192 }
  0x5d   : > { %p1219_p1 = scmp.lt.u32.totalorder %s1574_s25, %s1800_s0  ;;  %p1220_p3 = scmp.lt.u32.totalorder %s1218_s13, %s1213_s1 }
  0x5e   : > { %p1216_p11 = pnand %p1214_p7, %p1505_p0  ;;  %p1222_p2 = scmp.lt.u32.totalorder %s1213_s1, %s1574_s25 }
  0x5f   : > { %p1221_p4 = por %p1220_p3, %p1219_p1 }
  0x60   : > { %p1217_p13 = pneg %p1216_p11 }
  0x61   : > { %p1223_p5 = por %p1222_p2, %p1221_p4 }
  0x63   : > { %p1224_p6 = pnand %p1223_p5, %p1217_p13 }
  0x65   : > { %1227 = shalt.err (!%p1224_p6)
}
  0x66   : > { %s1228_s7 = scalar_lea.vmem %s1577_s20, 64  ;;  %s1383_s17 = smov [#allocation2]  }
  0x67   : > { %p1229_p10 = scmp.ne.s32.totalorder %s1577_s20, %s1228_s7  ;;  %s1233_s12 = sshll.u32 %s1383_s17, 4  ;;  %s1234_s12 = int_to_ptr.vmem [resolvable:$false] %s1233_s12 }
  0x68   : > { %s1235_s24 = scalar_lea.vmem %s1234_s12, 128  ;;  %p1236_p7 = scmp.lt.s32.totalorder %s1577_s20, %s1234_s12 }
  0x69   : > { %p1231_p8 = pnand %p1229_p10, %p1505_p0  ;;  %p1237_p11 = scmp.lt.s32.totalorder %s1235_s24, %s1228_s7 }
  0x6b   : > { %p1232_p9 = pneg %p1231_p8  ;;  %p1238_p1 = por %p1237_p11, %p1236_p7 }
  0x6d   : > { %p1239_p3 = pnand %p1238_p1, %p1232_p9 }
  0x6f   : > { %1242 = shalt.err (!%p1239_p3)
}
  0x70   : > { %1054 = dma.hbm_to_vmem [thread:$0]  (!%p1483_p12), %s1574_s25, 64, %s1577_s20, %s202_s30  }
  0x71   : > { %s241_s1 = scalar_lea.vmem [#allocation7], %s1481_s8  ;;  %s1003_s27 = sshll.u32 %s1475_s6, 3 }
  0x72   : > { %s248_s26 = sshll.u32 %s241_s1, 4  ;;  %s1243_s13 = scalar_lea.hbm %s1583_s3, 64  ;;  %s249_s26 = int_to_ptr.vmem [resolvable:$true] %s248_s26 }
  0x73   : > { %p1244_p13 = scmp.ne.s32.totalorder %s1583_s3, %s1243_s13  ;;  %s1248_s7 = scalar_lea.hbm %s1802_s2, 192 }
  0x74   : > { %p1249_p5 = scmp.lt.u32.totalorder %s1583_s3, %s1802_s2  ;;  %p1250_p6 = scmp.lt.u32.totalorder %s1248_s7, %s1243_s13 }
  0x75   : > { %p1246_p4 = pnand %p1244_p13, %p1505_p0  ;;  %p1252_p8 = scmp.lt.u32.totalorder %s1243_s13, %s1583_s3 }
  0x76   : > { %p1251_p10 = por %p1250_p6, %p1249_p5 }
  0x77   : > { %p1247_p2 = pneg %p1246_p4 }
  0x78   : > { %p1253_p9 = por %p1252_p8, %p1251_p10 }
  0x7a   : > { %p1254_p7 = pnand %p1253_p9, %p1247_p2 }
  0x7c   : > { %1257 = shalt.err (!%p1254_p7)
}
  0x7d   : > { %s1258_s30 = scalar_lea.vmem %s249_s26, 64  ;;  %s1384_s8 = smov [#allocation7]  }
  0x7e   : > { %p1259_p11 = scmp.ne.s32.totalorder %s249_s26, %s1258_s30  ;;  %s1263_s25 = sshll.u32 %s1384_s8, 4  ;;  %s1264_s25 = int_to_ptr.vmem [resolvable:$false] %s1263_s25 }
  0x7f   : > { %s1265_s20 = scalar_lea.vmem %s1264_s25, 128  ;;  %p1266_p13 = scmp.lt.s32.totalorder %s249_s26, %s1264_s25 }
  0x80   : > { %p1261_p1 = pnand %p1259_p11, %p1505_p0  ;;  %p1267_p4 = scmp.lt.s32.totalorder %s1265_s20, %s1258_s30 }
  0x82   : > { %p1262_p3 = pneg %p1261_p1  ;;  %p1268_p12 = por %p1267_p4, %p1266_p13 }
  0x84   : > { %p1269_p5 = pnand %p1268_p12, %p1262_p3 }
  0x86   : > { %1272 = shalt.err (!%p1269_p5)
}
  0x87   : > { %p1830_p6 = scmp.ne.s32.totalorder %s1824_s9, 0  ;;  %s1004_s24 = sshll.u32 %s1377_s21, 7 }
  0x88   : > { %s280_s1 = scalar_lea.vmem [#allocation10], %s1003_s27  ;;  %s285_s7 = scalar_lea.hbm %s1804_s4, %s1004_s24 }
  0x89   : > { %1060 = dma.hbm_to_vmem [thread:$0]  (!%p1830_p6), %s1583_s3, 64, %s249_s26, %s1499_s16  }
  0x8a   : > { %s287_s13 = sshll.u32 %s280_s1, 4  ;;  %s1273_s17 = scalar_lea.hbm %s285_s7, 128  ;;  %s288_s13 = int_to_ptr.vmem [resolvable:$true] %s287_s13 }
  0x8b   : > { %p1274_p12 = scmp.ne.s32.totalorder %s285_s7, %s1273_s17  ;;  %s1278_s8 = scalar_lea.hbm %s1804_s4, 384 }
  0x8c   : > { %p1279_p8 = scmp.lt.u32.totalorder %s285_s7, %s1804_s4  ;;  %p1280_p9 = scmp.lt.u32.totalorder %s1278_s8, %s1273_s17 }
  0x8d   : > { %p1276_p2 = pnand %p1274_p12, %p1505_p0  ;;  %p1282_p11 = scmp.lt.u32.totalorder %s1273_s17, %s285_s7 }
  0x8e   : > { %p1281_p7 = por %p1280_p9, %p1279_p8 }
  0x8f   : > { %p1277_p10 = pneg %p1276_p2 }
  0x90   : > { %p1283_p1 = por %p1282_p11, %p1281_p7 }
  0x92   : > { %p1284_p3 = pnand %p1283_p1, %p1277_p10 }
  0x94   : > { %1287 = shalt.err (!%p1284_p3)
}
  0x95   : > { %s1288_s6 = scalar_lea.vmem %s288_s13, 128  ;;  %s1385_s16 = smov [#allocation10]  }
  0x96   : > { %p1289_p13 = scmp.ne.s32.totalorder %s288_s13, %s1288_s6  ;;  %s1293_s26 = sshll.u32 %s1385_s16, 4  ;;  %s1294_s26 = int_to_ptr.vmem [resolvable:$false] %s1293_s26 }
  0x97   : > { %s1295_s27 = scalar_lea.vmem %s1294_s26, 256  ;;  %p1296_p12 = scmp.lt.s32.totalorder %s288_s13, %s1294_s26 }
  0x98   : > { %p1291_p4 = pnand %p1289_p13, %p1505_p0  ;;  %p1297_p2 = scmp.lt.s32.totalorder %s1295_s27, %s1288_s6 }
  0x9a   : > { %p1292_p5 = pneg %p1291_p4  ;;  %p1298_p6 = por %p1297_p2, %p1296_p12 }
  0x9c   : > { %p1299_p8 = pnand %p1298_p6, %p1292_p5 }
  0x9e   : > { %1302 = shalt.err (!%p1299_p8)
}
  0x9f   : > { %p1831_p9 = scmp.ne.s32.totalorder %s1824_s9, 0  ;;  %p1832_p10 = scmp.ne.s32.totalorder %s1827_s10, 0 }
  0xa0   : > { %s1649_s23 = sand.u32 (!%p1832_p10), 1, %s1369_s19   ;;  %p1833_p0 = scmp.ne.s32.totalorder (!%p1832_p10), %s1820_s28, 0 }
  0xa1   : > { %1066 = dma.hbm_to_vmem [thread:$0]  (!%p1831_p9), %s285_s7, 128, %s288_s13, %s1546_s15  }
  0xa2   : > { %296 = sbr.rel (%p1832_p10) target bundleno = 1014 (0x3f6), region = 40  ;;  %s1652_s20 = sshll.u32 (!%p1832_p10), %s1649_s23, 2 }
  0xa3   : > { %s299_s24 = scalar_lea.sflag (!%p1832_p10), [#allocation3], %s1649_s23  ;;  %s302_s1 = scalar_lea.vmem (!%p1832_p10), [#allocation2], %s1652_s20 }
  0xa9   : > { %1348 = dma.done.wait (%p1833_p0), %s299_s24, 64  }
  0xaa   : > { %1350 = vsyncadd (%p1833_p0), %s299_s24, 4294967232  ;;  %s307_s9 = sand.u32 1, %s1442_s22   ;;  %s311_s15 = scalar_lea.vmem [#allocation5], %s1652_s20 }
  0xab   : > { %s308_s10 = scalar_lea.sflag [#allocation6], %s307_s9 }
  0xac   : > { %1352 = dma.done.wait (%p1833_p0), %s308_s10, 128  }
  0xad   : > { %1354 = vsyncadd (%p1833_p0), %s308_s10, 4294967168  ;;  %s1009_s13 = sshll.u32 %s1649_s23, 5  ;;  %s320_s14 = scalar_lea.vmem [#allocation7], %s1652_s20 }
  0xae   : > { %s326_s11 = scalar_lea.sflag [#allocation9], %s307_s9  ;;  %s1668_s7 = scalar_lea.vmem [#allocation8], %s1009_s13 }
  0xaf   : > { %1356 = dma.done.wait (%p1833_p0), %s326_s11, 640  }
  0xb0   : > { %1358 = vsyncadd (%p1833_p0), %s326_s11, 4294966656  ;;  %v420_v0 = vlaneseq  ;;  %v1386_v1 = vmov 1966171168   ;;  %v386_v6 = vld [vmem:[%s302_s1] sm:$0xf]  ;;  %v1019_v8 = vld [vmem:[%s1668_s7] sm:$0xff]  }
  0xb1   : > { %v418_v2 = vunpack.c.l.s4 %v1386_v1  ;;  %v1678_v7 = vunpack.c.l.bf16 %v386_v6  ;;  %v1034_v11 = vld [vmem:[%s1668_s7 + $0x8] sm:$0xff]   ;;  %v1020_v13 = vunpack.c.l.bf16 %v1019_v8  ;;  %v1021_v18 = vunpack.c.h.bf16 %v1019_v8  ;;  %v1035_v22 = vld [vmem:[%s1668_s7 + $0x10] sm:$0xff]   ;;  %v1036_v37 = vld [vmem:[%s1668_s7 + $0x18] sm:$0xff]   ;;  %s1010_s28 = sshll.u32 %s1649_s23, 3  ;;  %s1388_s12 = smov 127  }
  0xb2   : > { %v1675_v3 = vshrl.u32 %v420_v0, 7  ;;  %v1024_v17 = vunpack.c.l.bf16 %v1034_v11  ;;  %v1025_v24 = vunpack.c.h.bf16 %v1034_v11  ;;  %v1028_v30 = vunpack.c.l.bf16 %v1035_v22  ;;  %s338_s17 = scalar_lea.vmem [#allocation10], %s1010_s28  ;;  %s1012_s30 = sshll.u32 %s1442_s22, 3 }
  0xb3   : > { %v419_v4 = vunpack.c.0.s8 %v418_v2  ;;  %v416_v12 = vcombine.high %v1678_v7, %v1678_v7  ;;  %v1029_v39 = vunpack.c.h.bf16 %v1035_v22  ;;  %v1032_v43 = vunpack.c.l.bf16 %v1036_v37  ;;  %v1692_v51 = vld [vmem:[%s338_s17] sm:$0xff]  ;;  %s1389_s8 = smov 120   ;;  %s384_s25 = scalar_lea.vmem [#allocation11], %s1010_s28 }
  0xb4   : > { %v467_v10 = vsub.s32 0, %v1675_v3  ;;  %v1033_v46 = vunpack.c.h.bf16 %v1036_v37  ;;  %v638_v50 = vsub.s32 1, %v1675_v3  ;;  %v645_v53 = vsub.s32 2, %v1675_v3  ;;  %s835_s3 = sshll.u32 %s384_s25, 4  ;;  %s1014_s6 = sshll.u32 %s1442_s22, 7  ;;  %s1754_s3 = int_to_ptr.vmem [resolvable:$true] %s835_s3 }
  0xb5   : > { %v422_v5 = vsub.s32 %v419_v4, %v1675_v3  ;;  %v659_v55 = vsub.s32 4, %v1675_v3  ;;  %v652_v57 = vsub.s32 3, %v1675_v3  ;;  %v673_v59 = vsub.s32 6, %v1675_v3  ;;  %s1759_s20 = scalar_lea.hbm %s1805_s5, %s1014_s6  ;;  %s822_s24 = scalar_lea.sflag [#allocation4], %s1649_s23 }
  0xb6   : > { %v639_v52 = vrot.slane %v1692_v51, %v638_v50  ;;  %v632_v54 = vrot.slane %v1692_v51, %v467_v10  ;;  %v646_v56 = vrot.slane %v1692_v51, %v645_v53  ;;  %v666_v61 = vsub.s32 5, %v1675_v3  ;;  %s1303_s1 = scalar_lea.vmem %s1754_s3, 128  ;;  %p1834_p7 = scmp.ne.s32.totalorder %s1821_s29, 0 }
  0xb7   : > { %v423_v9 = vrot.slane %v1678_v7, %v422_v5  ;;  %v430_v16 = vrot.slane %v416_v12, %v422_v5  ;;  %v660_v58 = vrot.slane %v1692_v51, %v659_v55  ;;  %v653_v60 = vrot.slane %v1692_v51, %v652_v57  ;;  %p1304_p6 = scmp.ne.s32.totalorder %s1754_s3, %s1303_s1  ;;  %s1390_s22 = smov [#allocation11]  }
  0xb8   : > { %v674_v62 = vrot.slane %v1692_v51, %v673_v59  ;;  %v667_v63 = vrot.slane %v1692_v51, %v666_v61  ;;  %v680_v1 = vsub.s32 7, %v1675_v3  ;;  %v1387_v4 = vmov 0   ;;  %s1307_s9 = sshll.u32 %s1390_s22, 4  ;;  %s1308_s9 = int_to_ptr.vmem [resolvable:$false] %s1307_s9 }
  0xb9   : > { %v439_v14 = vrot.slane %v423_v9, %v422_v5  ;;  %v431_v15 = vcombine.high %v423_v9, %v423_v9  ;;  %v446_v23 = vrot.slane %v430_v16, %v422_v5  ;;  %v432_v25 = vcombine.high %v430_v16, %v430_v16  ;;  %1111 = vset.pattern.permute.xlu1 %v1387_v4  ;;  %p1305_p11 = pnand %p1304_p6, %p1834_p7  ;;  %s1309_s10 = scalar_lea.vmem %s1308_s9, 256 }
  0xba   : > { %v681_v2 = vrot.slane %v1692_v51, %v680_v1  ;;  %1112 = vset.pattern.permute.xlu0 %v1387_v4  ;;  %vm767_vm0 = vcmask 1041409   ;;  %vm769_vm1 = vcmask 1042434   ;;  %vm771_vm2 = vcmask 1043459   ;;  %p1310_p3 = scmp.lt.s32.totalorder %s1754_s3, %s1308_s9  ;;  %p1311_p13 = scmp.lt.s32.totalorder %s1309_s10, %s1303_s1 }
  0xbb   : > { %v468_v19 = vrot.slane %v439_v14, %v467_v10  ;;  %v461_v20 = vcombine.high %v439_v14, %v439_v14  ;;  %v453_v21 = vrot.slane %v431_v15, %v422_v5  ;;  %v484_v31 = vrot.slane %v446_v23, %v467_v10  ;;  %p1306_p1 = pneg %p1305_p11 }
  0xbc   : > { %v460_v32 = vrot.slane %v432_v25, %v422_v5  ;;  %v462_v36 = vcombine.high %v446_v23, %v446_v23  ;;  %v390_v5 = vld [vmem:[%s320_s14] sm:$0xf]  ;;  %vm773_vm3 = vcmask 1044484   ;;  %vm775_vm4 = vcmask 1045509   ;;  %p1312_p4 = por %p1311_p13, %p1310_p3 }
  0xbd   : > { %v505_v26 = vmul.f32 %v1020_v13, %v468_v19  ;;  %v476_v27 = vrot.slane %v461_v20, %v467_v10  ;;  %v472_v28 = vrot.slane %v453_v21, %v467_v10  ;;  %v463_v29 = vcombine.high %v453_v21, %v453_v21 }
  0xbe   : > { %v488_v40 = vrot.slane %v460_v32, %v467_v10  ;;  %v464_v41 = vcombine.high %v460_v32, %v460_v32  ;;  %v509_v42 = vmul.f32 %v1028_v30, %v484_v31  ;;  %v492_v44 = vrot.slane %v462_v36, %v467_v10  ;;  %p1313_p5 = pnand %p1312_p4, %p1306_p1 }
  0xbf   : > { %513 = vadd.xlane.f32.xlu0 %v505_v26  ;;  %v507_v33 = vmul.f32 %v1024_v17, %v476_v27  ;;  %v506_v34 = vmul.f32 %v1021_v18, %v472_v28  ;;  %v480_v35 = vrot.slane %v463_v29, %v467_v10  ;;  %v391_v6 = vunpack.c.l.bf16 %v390_v5 }
  0xc0   : > { %v510_v45 = vmul.f32 %v1029_v39, %v488_v40  ;;  %v496_v47 = vrot.slane %v464_v41, %v467_v10  ;;  %v511_v48 = vmul.f32 %v1032_v43, %v492_v44  ;;  %vm777_vm5 = vcmask 1046534  }
  0xc1   : > { %517 = vadd.xlane.f32.xlu1 %v507_v33  ;;  %v508_v38 = vmul.f32 %v1025_v24, %v480_v35  ;;  %v396_v8 = vmul.f32 %v391_v6, %v1678_v7  ;;  %vm779_vm6 = vcmask 1047559   ;;  %vm782_vm7 = vcmask 64512  }
  0xc2   : > { %v512_v49 = vmul.f32 %v1033_v46, %v496_v47  ;;  %vm808_vm9 = vcmask 7168  }
  0xc3   : > { %515 = vadd.xlane.f32.xlu0 %v506_v34 }
  0xc5   : > { %519 = vadd.xlane.f32.xlu1 %v508_v38 }
  0xc7   : > { %521 = vadd.xlane.f32.xlu0 %v509_v42 }
  0xc9   : > { %523 = vadd.xlane.f32.xlu1 %v510_v45 }
  0xcb   : > { %525 = vadd.xlane.f32.xlu0 %v511_v48 }
  0xcd   : > { %527 = vadd.xlane.f32.xlu1 %v512_v49 }
  0xde   : > { %641 = vbcast.lane.b32.xlu1 %v639_v52, 256 }
  0xe1   : > { %634 = vbcast.lane.b32.xlu0 %v632_v54, 256 }
  0xe2   : > { %648 = vbcast.lane.b32.xlu1 %v646_v56, 256 }
  0xe5   : > { %662 = vbcast.lane.b32.xlu0 %v660_v58, 256 }
  0xe6   : > { %655 = vbcast.lane.b32.xlu1 %v653_v60, 256 }
  0xe9   : > { %676 = vbcast.lane.b32.xlu0 %v674_v62, 256 }
  0xea   : > { %669 = vbcast.lane.b32.xlu1 %v667_v63, 256 }
  0xee   : > { %683 = vbcast.lane.b32.xlu1 %v681_v2, 256 }
 0x108   : > { %397 = vadd.xlane.f32.xlu0 %v396_v8 }
 0x14c   : > { %v1711_v9 = vpop.xlane.xlu0 %513 }
 0x14d   : > { %v556_v10 = vand.u32 2147483647, %v1711_v9  ;;  %v548_v57 = vmin.f32 %v1711_v9, 0.0 }
 0x14e   : > { %v1714_v11 = vpop.xlane.xlu1 %517 }
 0x14f   : > { %v564_v12 = vsub.f32 0.0, %v556_v10  ;;  %v558_v13 = vand.u32 2147483647, %v1714_v11  ;;  %v550_v4 = vmin.f32 %v1714_v11, 0.0 }
 0x150   : > { %v1717_v14 = vpop.xlane.xlu0 %515 }
 0x151   : > { %v572_v15 = vmul.f32 1.442695, %v564_v12  ;;  %v566_v16 = vsub.f32 0.0, %v558_v13  ;;  %v557_v17 = vand.u32 2147483647, %v1717_v14  ;;  %v549_v8 = vmin.f32 %v1717_v14, 0.0 }
 0x152   : > { %v1720_v18 = vpop.xlane.xlu1 %519 }
 0x153   : > { %1113 = vpow2.f32 %v572_v15  ;;  %v576_v19 = vmul.f32 1.442695, %v566_v16  ;;  %v565_v20 = vsub.f32 0.0, %v557_v17  ;;  %v559_v21 = vand.u32 2147483647, %v1720_v18 }
 0x154   : > { %v1723_v22 = vpop.xlane.xlu0 %521 }
 0x155   : > { %1115 = vpow2.f32 %v576_v19  ;;  %v574_v23 = vmul.f32 1.442695, %v565_v20  ;;  %v560_v24 = vand.u32 2147483647, %v1723_v22  ;;  %v567_v25 = vsub.f32 0.0, %v559_v21 }
 0x156   : > { %v1726_v26 = vpop.xlane.xlu1 %523  ;;  %v552_v20 = vmin.f32 %v1723_v22, 0.0 }
 0x157   : > { %1117 = vpow2.f32 %v574_v23  ;;  %v568_v27 = vsub.f32 0.0, %v560_v24  ;;  %v561_v28 = vand.u32 2147483647, %v1726_v26  ;;  %v578_v29 = vmul.f32 1.442695, %v567_v25 }
 0x158   : > { %v1729_v30 = vpop.xlane.xlu0 %525  ;;  %v553_v22 = vmin.f32 %v1726_v26, 0.0 }
 0x159   : > { %v580_v31 = vmul.f32 1.442695, %v568_v27  ;;  %v569_v32 = vsub.f32 0.0, %v561_v28  ;;  %v562_v33 = vand.u32 2147483647, %v1729_v30  ;;  %1119 = vpow2.f32 %v578_v29 }
 0x15a   : > { %v1732_v34 = vpop.xlane.xlu1 %527  ;;  %v551_v28 = vmin.f32 %v1720_v18, 0.0 }
 0x15b   : > { %1121 = vpow2.f32 %v580_v31  ;;  %v582_v35 = vmul.f32 1.442695, %v569_v32  ;;  %v570_v36 = vsub.f32 0.0, %v562_v33  ;;  %v563_v37 = vand.u32 2147483647, %v1732_v34 }
 0x15c   : > { %v635_v6 = vpop.permute.xlu0 %634 }
 0x15d   : > { %v1114_v38 = vpop.eup %1113  ;;  %1123 = vpow2.f32 %v582_v35  ;;  %v584_v39 = vmul.f32 1.442695, %v570_v36  ;;  %v571_v41 = vsub.f32 0.0, %v563_v37 }
 0x15e   : > { %v588_v40 = vadd.f32 1.0, %v1114_v38  ;;  %v642_v52 = vpop.permute.xlu1 %641 }
 0x15f   : > { %v1116_v42 = vpop.eup %1115  ;;  %1125 = vpow2.f32 %v584_v39  ;;  %v586_v44 = vmul.f32 1.442695, %v571_v41  ;;  %v555_v39 = vmin.f32 %v1732_v34, 0.0 }
 0x160   : > { %1127 = vlog2.f32 %v588_v40  ;;  %v590_v43 = vadd.f32 1.0, %v1116_v42  ;;  %v663_v38 = vpop.permute.xlu0 %662 }
 0x161   : > { %v1118_v45 = vpop.eup %1117 }
 0x162   : > { %1129 = vlog2.f32 %v590_v43  ;;  %v589_v46 = vadd.f32 1.0, %v1118_v45  ;;  %v649_v61 = vpop.permute.xlu1 %648 }
 0x163   : > { %1131 = vpow2.f32 %v586_v44  ;;  %v1120_v47 = vpop.eup %1119 }
 0x164   : > { %1133 = vlog2.f32 %v589_v46  ;;  %v591_v49 = vadd.f32 1.0, %v1120_v47  ;;  %v554_v46 = vmin.f32 %v1729_v30, 0.0 }
 0x165   : > { %v1122_v48 = vpop.eup %1121 }
 0x166   : > { %v592_v50 = vadd.f32 1.0, %v1122_v48  ;;  %1135 = vlog2.f32 %v591_v49  ;;  %v656_v19 = vpop.permute.xlu1 %655 }
 0x167   : > { %v1124_v53 = vpop.eup %1123 }
 0x168   : > { %1137 = vlog2.f32 %v592_v50  ;;  %v593_v54 = vadd.f32 1.0, %v1124_v53  ;;  %v677_v53 = vpop.permute.xlu0 %676 }
 0x169   : > { %v1126_v55 = vpop.eup %1125 }
 0x16a   : > { %v1128_v56 = vpop.eup %1127  ;;  %v594_v58 = vadd.f32 1.0, %v1126_v55  ;;  %1139 = vlog2.f32 %v593_v54  ;;  %v670_v31 = vpop.permute.xlu1 %669  ;;  %v388_v55 = vld [vmem:[%s311_s15] sm:$0xf] }
 0x16b   : > { %v597_v59 = vmul.f32 0.6931472, %v1128_v56  ;;  %v389_v56 = vunpack.c.l.bf16 %v388_v55 }
 0x16c   : > { %v1130_v60 = vpop.eup %1129  ;;  %1141 = vlog2.f32 %v594_v58 }
 0x16d   : > { %v1132_v62 = vpop.eup %1131  ;;  %v612_v63 = vsub.f32 %v548_v57, %v597_v59  ;;  %v601_v1 = vmul.f32 0.6931472, %v1130_v60  ;;  %v393_v57 = vmul.f32 %v389_v56, %v1678_v7 }
 0x16e   : > { %v1134_v2 = vpop.eup %1133  ;;  %v595_v5 = vadd.f32 1.0, %v1132_v62  ;;  %v684_v45 = vpop.permute.xlu1 %683 }
 0x16f   : > { %v599_v10 = vmul.f32 0.6931472, %v1134_v2  ;;  %v620_v12 = vsub.f32 0.0, %v612_v63  ;;  %v614_v16 = vsub.f32 %v550_v4, %v601_v1  ;;  %v734_v2 = vand.u32 127, %v420_v0 }
 0x170   : > { %1143 = vlog2.f32 %v595_v5  ;;  %v1136_v9 = vpop.eup %1135 }
 0x171   : > { %v613_v13 = vsub.f32 %v549_v8, %v599_v10  ;;  %v693_v15 = vmul.f32 %v635_v6, %v620_v12  ;;  %v603_v11 = vmul.f32 0.6931472, %v1136_v9  ;;  %v622_v25 = vsub.f32 0.0, %v614_v16 }
 0x172   : > { %v1138_v17 = vpop.eup %1137  ;;  %v737_v5 = vsub.s32 %v734_v2, %v1675_v3 }
 0x173   : > { %v621_v21 = vsub.f32 0.0, %v613_v13  ;;  %710 = vperm.xlu1 %1111, %v693_v15   ;;  %v605_v23 = vmul.f32 0.6931472, %v1138_v17  ;;  %v615_v29 = vsub.f32 %v551_v28, %v603_v11  ;;  %v695_v33 = vmul.f32 %v649_v61, %v622_v25 }
 0x174   : > { %v1140_v14 = vpop.eup %1139 }
 0x175   : > { %v694_v24 = vmul.f32 %v642_v52, %v621_v21  ;;  %v616_v27 = vsub.f32 %v552_v20, %v605_v23  ;;  %v607_v36 = vmul.f32 0.6931472, %v1140_v14  ;;  %v623_v41 = vsub.f32 0.0, %v615_v29 }
 0x176   : > { %v1142_v32 = vpop.eup %1141 }
 0x177   : > { %713 = vperm.xlu1 %1111, %v694_v24   ;;  %v624_v35 = vsub.f32 0.0, %v616_v27  ;;  %v617_v43 = vsub.f32 %v553_v22, %v607_v36  ;;  %v609_v44 = vmul.f32 0.6931472, %v1142_v32  ;;  %v696_v48 = vmul.f32 %v656_v19, %v623_v41 }
 0x178   : > { %v786_v36 = vadd.f32 1.0, %v1692_v51 }
 0x179   : > { %v697_v42 = vmul.f32 %v663_v38, %v624_v35  ;;  %v625_v49 = vsub.f32 0.0, %v617_v43  ;;  %v618_v50 = vsub.f32 %v554_v46, %v609_v44 }
 0x17a   : > { %v1144_v37 = vpop.eup %1143  ;;  %v787_v46 = vsub.f32 0.0, %v786_v36 }
 0x17b   : > { %716 = vperm.xlu1 %1111, %v695_v33   ;;  %v611_v40 = vmul.f32 0.6931472, %v1144_v37  ;;  %v698_v26 = vmul.f32 %v670_v31, %v625_v49  ;;  %v626_v34 = vsub.f32 0.0, %v618_v50 }
 0x17d   : > { %v619_v18 = vsub.f32 %v555_v39, %v611_v40  ;;  %v699_v54 = vmul.f32 %v677_v53, %v626_v34 }
 0x17f   : > { %v627_v47 = vsub.f32 0.0, %v619_v18  ;;  %722 = vperm.xlu1 %1111, %v697_v42  }
 0x181   : > { %v700_v52 = vmul.f32 %v684_v45, %v627_v47  ;;  %v800_v47 = vstv %s1012_s30 }
 0x182   : > { %v801_v51 = vadd.s32 %v800_v47, %v1675_v3 }
 0x183   : > { %731 = vperm.xlu0 %1112, %v700_v52   ;;  %719 = vperm.xlu1 %1111, %v696_v48  }
 0x184   : > { %vm802_vm8 = vcmp.lt.s32.totalorder %v801_v51, 20 }
 0x187   : > { %725 = vperm.xlu1 %1111, %v698_v26  }
 0x18b   : > { %728 = vperm.xlu1 %1111, %v699_v54  }
 0x195   : > { %v398_v30 = vpop.xlane.xlu0 %397 }
 0x196   : > { %v538_v58 = vsub.f32 0.0, %v398_v30 }
 0x198   : > { %v540_v59 = vand.u32 2147483647, %v538_v58  ;;  %v539_v32 = vmin.f32 %v538_v58, 0.0 }
 0x19a   : > { %v541_v60 = vsub.f32 0.0, %v540_v59 }
 0x19c   : > { %v542_v62 = vmul.f32 1.442695, %v541_v60 }
 0x19e   : > { %1145 = vpow2.f32 %v542_v62 }
 0x1a8   : > { %v1146_v10 = vpop.eup %1145 }
 0x1a9   : > { %v544_v13 = vadd.f32 1.0, %v1146_v10 }
 0x1ab   : > { %1147 = vlog2.f32 %v544_v13 }
 0x1af   : > { %394 = vadd.xlane.f32.xlu1 %v393_v57 }
 0x1b5   : > { %v1148_v31 = vpop.eup %1147 }
 0x1b6   : > { %v546_v33 = vmul.f32 0.6931472, %v1148_v31 }
 0x1b8   : > { %v547_v35 = vsub.f32 %v539_v32, %v546_v33 }
 0x1ba   : > { %v789_v37 = vmul.f32 %v786_v36, %v547_v35 }
 0x1f2   : > { %v711_v61 = vpop.permute.xlu1 %710 }
 0x1f3   : > { %v738_v12 = vrot.slane %v711_v61, %v737_v5 }
 0x1f6   : > { %v714_v63 = vpop.permute.xlu1 %713 }
 0x1f7   : > { %v742_v6 = vrot.slane %v714_v63, %v737_v5 }
 0x1f9   : > { %v768_v15 = vsel %vm767_vm0, %v742_v6, %v738_v12 }
 0x1fa   : > { %v717_v1 = vpop.permute.xlu1 %716 }
 0x1fb   : > { %v746_v7 = vrot.slane %v717_v1, %v737_v5 }
 0x1fd   : > { %v770_v17 = vsel %vm769_vm1, %v746_v7, %v768_v15 }
 0x1fe   : > { %v723_v4 = vpop.permute.xlu1 %722 }
 0x1ff   : > { %v754_v0 = vrot.slane %v723_v4, %v737_v5 }
 0x202   : > { %v720_v8 = vpop.permute.xlu1 %719  ;;  %v732_v21 = vpop.permute.xlu0 %731 }
 0x203   : > { %v750_v9 = vrot.slane %v720_v8, %v737_v5  ;;  %v766_v25 = vrot.slane %v732_v21, %v737_v5 }
 0x205   : > { %v772_v19 = vsel %vm771_vm2, %v750_v9, %v770_v17 }
 0x206   : > { %v726_v16 = vpop.permute.xlu1 %725  ;;  %v774_v11 = vsel %vm773_vm3, %v754_v0, %v772_v19 }
 0x207   : > { %v758_v20 = vrot.slane %v726_v16, %v737_v5 }
 0x209   : > { %v776_v27 = vsel %vm775_vm4, %v758_v20, %v774_v11 }
 0x20a   : > { %v729_v23 = vpop.permute.xlu1 %728 }
 0x20b   : > { %v762_v24 = vrot.slane %v729_v23, %v737_v5 }
 0x20d   : > { %v778_v14 = vsel %vm777_vm5, %v762_v24, %v776_v27 }
 0x20e   : > { %v780_v28 = vsel %vm779_vm6, %v766_v25, %v778_v14 }
 0x20f   : > { %v783_v29 = vsel %vm782_vm7, %v780_v28, 0.0 }
 0x210   : > { %784 = vadd.xlane.f32.xlu1 %v783_v29 }
 0x221   : > { %791 = vrot.lane.b32.xlu1 %v789_v37, %s1388_s12 }
 0x23c   : > { %v395_v38 = vpop.xlane.xlu1 %394 }
 0x23d   : > { %v530_v22 = vand.u32 2147483647, %v395_v38  ;;  %v529_v44 = vmin.f32 %v395_v38, 0.0 }
 0x23f   : > { %v531_v39 = vsub.f32 0.0, %v530_v22 }
 0x241   : > { %v532_v40 = vmul.f32 1.442695, %v531_v39 }
 0x243   : > { %1149 = vpow2.f32 %v532_v40 }
 0x24d   : > { %v1150_v41 = vpop.eup %1149 }
 0x24e   : > { %v534_v42 = vadd.f32 1.0, %v1150_v41 }
 0x250   : > { %1151 = vlog2.f32 %v534_v42 }
 0x25a   : > { %v1152_v43 = vpop.eup %1151 }
 0x25b   : > { %v536_v18 = vmul.f32 0.6931472, %v1152_v43 }
 0x25d   : > { %v537_v45 = vsub.f32 %v529_v44, %v536_v18 }
 0x25f   : > { %v788_v49 = vmul.f32 %v787_v46, %v537_v45 }
 0x29d   : > { %v785_v48 = vpop.xlane.xlu1 %784 }
 0x29e   : > { %v795_v52 = vmul.f32 2.5, %v785_v48 }
 0x2a1   : > { %v792_v50 = vpop.permute.xlu1 %791 }
 0x2a2   : > { %v794_v26 = vsub.f32 %v788_v49, %v792_v50 }
 0x2a4   : > { %v796_v34 = vadd.f32 %v795_v52, %v794_v26 }
 0x2a6   : > { %v803_v53 = vsel %vm802_vm8, %v796_v34, 0.0 }
 0x2a7   : > { %805 = vrot.lane.b32.xlu0 %v803_v53, %s1389_s8 }
 0x319   : > { %v806_v54 = vpop.permute.xlu0 %805 }
 0x31a   : > { %v809_v55 = vsel %vm808_vm9, %v806_v54, 0.0 }
 0x31b   : > { %810 = vadd.xlane.f32.xlu0 %v809_v55 }
 0x3a8   : > { %v811_v56 = vpop.xlane.xlu0 %810 }
 0x3a9   : > { %v812_v57 = vrot.slane %v811_v56, 4 }
 0x3ab   : > { %v813_v30 = vadd.f32 %v812_v57, %v811_v56 }
 0x3ad   : > { %v814_v3 = vrot.slane %v813_v30, 2 }
 0x3af   : > { %v815_v58 = vadd.f32 %v814_v3, %v813_v30 }
 0x3b1   : > { %v816_v59 = vrot.slane %v815_v58, 1 }
 0x3b3   : > { %v817_v60 = vadd.f32 %v816_v59, %v815_v58 }
 0x3b5   : > { %1037 = vpush %v817_v60 }
 0x3e6   : > { %s1038_s16 = spop %1037 }
 0x3e7   : > { %v819_v61 = vstv %s1038_s16 }
 0x3e8   : > { %820 = vst [vmem:[%s384_s25] sm:$0xff] %v819_v61 }
 0x3e9   : > { %1316 = shalt.err (!%p1313_p5)
}
 0x3ea   : > { %s1317_s23 = scalar_lea.hbm %s1759_s20, 128  ;;  %s1321_s14 = scalar_lea.hbm %s1805_s5, 384 }
 0x3eb   : > { %p1318_p12 = scmp.ne.s32.totalorder %s1759_s20, %s1317_s23  ;;  %p1322_p9 = scmp.lt.u32.totalorder %s1759_s20, %s1805_s5 }
 0x3ec   : > { %p1323_p10 = scmp.lt.u32.totalorder %s1321_s14, %s1317_s23  ;;  %p1325_p6 = scmp.lt.u32.totalorder %s1317_s23, %s1759_s20 }
 0x3ed   : > { %p1319_p2 = pnand %p1318_p12, %p1834_p7 }
 0x3ee   : > { %p1324_p0 = por %p1323_p10, %p1322_p9 }
 0x3ef   : > { %p1320_p8 = pneg %p1319_p2 }
 0x3f0   : > { %p1326_p11 = por %p1325_p6, %p1324_p0 }
 0x3f2   : > { %p1327_p1 = pnand %p1326_p11, %p1320_p8 }
 0x3f4   : > { %1330 = shalt.err (!%p1327_p1)
}
 0x3f5   : > { %1049 = dma.vmem_to_hbm [thread:$0]  (%p1834_p7), %s1754_s3, 128, %s1759_s20, %s822_s24  }
 0x3f6 PF: > { %s1835_s28 = sld [smem:[#allocation19_spill]]  ;;  %p1072_p3 = scmp.ge.s32.totalorder %s1377_s21, 2 }
 0x3f7   : > { %s847_s17 = sand.u32 1, %s1365_s18  }
 0x3f8   : > { %s848_s12 = scalar_lea.sflag [#allocation4], %s847_s17 }
 0x3fc   : > { %p1836_p13 = scmp.ne.s32.totalorder %s1835_s28, 0 }
 0x3fe   : > { %p1068_p4 = pnand %p1072_p3, %p1836_p13 }
 0x400   : > { %1360 = dma.done.wait (!%p1068_p4), %s848_s12, 128  }
 0x401   : > { %1362 = vsyncadd (!%p1068_p4), %s848_s12, 4294967168  ;;  %s1837_s21 = sld [smem:[#allocation17_spill]]  ;;  %s1838_s30 = sld [smem:[#allocation16_spill]] }
 0x402   : > { %s1839_s20 = sld [smem:[#allocation18_spill]]  ;;  %s1840_s18 = smov %s1369_s19 }
 0x407   : > { %p24_p5 = scmp.ge.s32.totalorder %s1837_s21, 5   ;;  %s1841_s19 = smov %s1838_s30 }
 0x409   :  { %26 = sbr.rel (!%p24_p5) target bundleno = 12 (0xc), region = 133 }
 0x410   :  { %853 = vsyncpa [#allocation3], 1 }
 0x411   :  { %855 = vsyncpa [#allocation3 + $0x1], 1 }
 0x412   :  { %856 = vsyncpa [#allocation6], 1 }
 0x413   :  { %858 = vsyncpa [#allocation6 + $0x1], 1 }
 0x414   :  { %859 = vsyncpa [#allocation9], 1 }
 0x415   :  { %861 = vsyncpa [#allocation9 + $0x1], 1 }
 0x416   :  { %862 = vsyncpa [#allocation4], 1 }
 0x417   :  { %864 = vsyncpa [#allocation4 + $0x1], 1 }

</bundles_post_ra>
